<compile_context>
chip_gen: v5e
topology: v5e:2x2
jax: 0.10.0
libtpu: 0.0.40
codegen_flags: <defaults>
</compile_context>

<pallas_src>
import functools
import math

import jax
import jax.numpy as jnp
from jax.experimental import pallas as pl
from jax.experimental.pallas import tpu as pltpu


def _round_up(x: int, m: int) -> int:
    return ((x + m - 1) // m) * m


def _num_tensorcores() -> int:
    """2 for megacore chips (v4/v5p/v7x), else 1.  Heuristic only; safe fallback is 1."""
    try:
        kind = jax.devices()[0].device_kind.lower()
    except Exception:
        return 1
    for tag in ("v4", "v5p", "v7"):
        if tag in kind:
            return 2
    return 1


def _choose_tile(n: int, num_cores: int, max_tile: int) -> int:
    """Pick the lane-tile (points per grid step): multiple of 128, as large as allowed.

    Single-TC chips: one grid step for small N (no pointless serial split).
    2-TC chips: step count rounded to a multiple of num_cores for load balance.
    """
    max_tile = max(128, _round_up(max_tile, 128))
    if num_cores <= 1:
        return min(max_tile, _round_up(max(n, 1), 128))
    per_core = -(-n // num_cores)
    tile = min(max_tile, max(128, _round_up(per_core, 128)))
    steps = -(-n // tile)
    steps = _round_up(steps, num_cores)
    tile = max(128, _round_up(-(-n // steps), 128))
    return min(tile, max_tile)


def _make_mlp_kernel(n_layers: int, use_bf16: bool):
    """Kernel running the whole MLP on one lane-tile of points.

    Ref order: (x_ref, w0, b0, ..., w_{L-1}, b_{L-1}, out_ref), all feature-major:
    x_ref (in_dim, tile_n), w_l (out_l, in_l), b_l (out_l, 1), out_ref (out_dim, tile_n).
    tanh after every layer except the last (matches Net with act=nn.Tanh).
    """

    def kernel(*refs):
        x_ref = refs[0]
        out_ref = refs[-1]
        h = x_ref[...]                                    # (in_dim, tile_n), f32
        for l in range(n_layers):
            w = refs[1 + 2 * l][...]                      # (out_l, in_l)
            b = refs[2 + 2 * l][...]                      # (out_l, 1) -> lane broadcast
            if use_bf16 and 0 < l < n_layers - 1:
                # Interior (square) layers: bf16 MXU inputs, f32 accumulation.
                h = jnp.dot(w.astype(jnp.bfloat16), h.astype(jnp.bfloat16),
                            preferred_element_type=jnp.float32) + b
            else:
                h = jnp.dot(w, h, preferred_element_type=jnp.float32) + b
            if l < n_layers - 1:
                h = jnp.tanh(h)
        out_ref[...] = h.astype(out_ref.dtype)

    return kernel


def init_net_params(key, input_size, neurons_arr, output_size):
    """nn.Linear-style U(-1/sqrt(fan_in), 1/sqrt(fan_in)) init.

    Weights stored PyTorch-native (out_features, in_features); biases (out_features, 1).
    """
    dims = [input_size] + list(neurons_arr) + [output_size]
    params = []
    for i in range(len(dims) - 1):
        fan_in, fan_out = dims[i], dims[i + 1]
        key, kw, kb = jax.random.split(key, 3)
        bound = 1.0 / math.sqrt(fan_in)
        w = jax.random.uniform(kw, (fan_out, fan_in), jnp.float32, -bound, bound)
        b = jax.random.uniform(kb, (fan_out, 1), jnp.float32, -bound, bound)
        params.append((w, b))
    return params


@functools.partial(jax.jit, static_argnames=("tile_n", "use_bf16"))
def _net_forward_pallas_t(x_t, params, *, tile_n, use_bf16):
    """Run the MLP on feature-major x_t of shape (in_dim, N); N may be arbitrary."""
    in_dim, n = x_t.shape
    out_dim = params[-1][0].shape[0]
    n_layers = len(params)
    grid = (pl.cdiv(n, tile_n),)

    # x / out: tiled over the lane (points) axis; tail block handled by Pallas clipping.
    # Weights/biases: full arrays with constant index_maps (resident, not re-fetched).
    in_specs = [pl.BlockSpec((in_dim, tile_n), lambda i: (0, i))]
    flat_args = [x_t]
    for (w, b) in params:
        in_specs.append(pl.BlockSpec(w.shape, lambda i: (0, 0)))
        in_specs.append(pl.BlockSpec(b.shape, lambda i: (0, 0)))
        flat_args.append(w)
        flat_args.append(b)
    out_specs = pl.BlockSpec((out_dim, tile_n), lambda i: (0, i))

    return pl.pallas_call(
        _make_mlp_kernel(n_layers, use_bf16),
        out_shape=jax.ShapeDtypeStruct((out_dim, n), jnp.float32),
        grid=grid,
        in_specs=in_specs,
        out_specs=out_specs,
        compiler_params=pltpu.CompilerParams(
            dimension_semantics=("parallel",),
            # Big lane tiles exceed the scoped-VMEM default (16 MiB v5e / 32 MiB v6e,v7x);
            # 48 MiB stays under physical VMEM on every generation (64 MiB on v7x).
            vmem_limit_bytes=48 * 1024 * 1024,
        ),
    )(*flat_args)


def net_forward(inputs_list, params, tile_n=32768, use_bf16=False):
    """Mirror of Net.forward: each input flattened and used as one feature column.

    Internally runs feature-major (points on lanes) and returns (N, output_size).
    No padding / slicing copies: arbitrary N handled via Pallas tail-block clipping.
    """
    cols = [jnp.reshape(a, (-1,)).astype(jnp.float32) for a in inputs_list]
    x_t = jnp.stack(cols, axis=0)                         # (in_dim, N), feature-major
    n = x_t.shape[1]
    eff_tile = _choose_tile(n, _num_tensorcores(), int(tile_n))
    out_t = _net_forward_pallas_t(x_t, params, tile_n=eff_tile, use_bf16=use_bf16)
    return out_t.T                                        # (N, out_dim)


def net_forward_ref(inputs_list, params):
    """Pure-JAX reference (same math as the PyTorch module with act=Tanh)."""
    x = jnp.concatenate([jnp.reshape(a, (-1, 1)) for a in inputs_list], axis=1)
    h = x.astype(jnp.float32)
    for l, (w, b) in enumerate(params):
        h = h @ w.T + b.reshape(1, -1)
        if l < len(params) - 1:
            h = jnp.tanh(h)
    return h


if __name__ == "__main__":
    # Net(input_size=2, neurons_arr=[32, 32, 32], output_size=1, depth=2, act=nn.Tanh)
    input_size = 2
    neurons_arr = [32, 32, 32]
    output_size = 1
    n_points = 1000  # deliberately NOT a tile multiple: exercises the tail-clipping path

    key = jax.random.PRNGKey(0)
    key, k_x, k_t = jax.random.split(key, 3)
    # Two coordinate arrays (e.g. x and t collocation points), as in a PINN.
    x_coords = jax.random.uniform(k_x, (n_points,), jnp.float32)
    t_coords = jax.random.uniform(k_t, (n_points,), jnp.float32)
    inputs = [x_coords, t_coords]

    params = init_net_params(key, input_size, neurons_arr, output_size)
    ref = net_forward_ref(inputs, params)

    # 1) Default (f32) path: bit-faithful to the PyTorch module, strict tolerance.
    out = jax.block_until_ready(net_forward(inputs, params))
    assert out.shape == (n_points, output_size)
    assert jnp.allclose(out, ref, atol=1e-5, rtol=1e-5), "f32 kernel mismatch vs reference"

    # 2) Small forced tile -> multi-step grid with a partial tail block (coverage of the
    #    pl.cdiv grid + clipped tail writes).
    out_small_tile = jax.block_until_ready(net_forward(inputs, params, tile_n=256))
    assert jnp.allclose(out_small_tile, ref, atol=1e-5, rtol=1e-5), "tail-clipping mismatch"

    # 3) Optional bf16 MXU path for the interior layers (f32 accumulation); looser check.
    out_bf16 = jax.block_until_ready(net_forward(inputs, params, use_bf16=True))
    assert jnp.allclose(out_bf16, ref, atol=3e-2, rtol=3e-2), "bf16 kernel drifted too far"

    print("KERNEL_OK")
</pallas_src>

<mosaic_0001>
module attributes {stable_mosaic.version = 11 : i64} {
  func.func @kernel(%arg0: i32, %arg1: memref<2x1024xf32, #tpu.memory_space<vmem>>, %arg2: memref<32x2xf32, #tpu.memory_space<vmem>>, %arg3: memref<32x1xf32, #tpu.memory_space<vmem>>, %arg4: memref<32x32xf32, #tpu.memory_space<vmem>>, %arg5: memref<32x1xf32, #tpu.memory_space<vmem>>, %arg6: memref<32x32xf32, #tpu.memory_space<vmem>>, %arg7: memref<32x1xf32, #tpu.memory_space<vmem>>, %arg8: memref<1x32xf32, #tpu.memory_space<vmem>>, %arg9: memref<1x1xf32, #tpu.memory_space<vmem>>, %arg10: memref<1x1024xf32, #tpu.memory_space<vmem>>) attributes {dimension_semantics = [#tpu.dimension_semantics<parallel>], iteration_bounds = array<i64: 1>, scalar_prefetch = 0 : i64, scratch_operands = 0 : i64, tpu.core_type = #tpu.core_type<tc>, window_params = [{transform_indices = @transform_0, window_bounds = array<i64: 2, 1024>}, {pipeline_mode = #tpu.pipeline_mode<synchronous>, transform_indices = @transform_1, window_bounds = array<i64: 32, 2>}, {pipeline_mode = #tpu.pipeline_mode<synchronous>, transform_indices = @transform_2, window_bounds = array<i64: 32, 1>}, {pipeline_mode = #tpu.pipeline_mode<synchronous>, transform_indices = @transform_3, window_bounds = array<i64: 32, 32>}, {pipeline_mode = #tpu.pipeline_mode<synchronous>, transform_indices = @transform_4, window_bounds = array<i64: 32, 1>}, {pipeline_mode = #tpu.pipeline_mode<synchronous>, transform_indices = @transform_5, window_bounds = array<i64: 32, 32>}, {pipeline_mode = #tpu.pipeline_mode<synchronous>, transform_indices = @transform_6, window_bounds = array<i64: 32, 1>}, {pipeline_mode = #tpu.pipeline_mode<synchronous>, transform_indices = @transform_7, window_bounds = array<i64: 1, 32>}, {pipeline_mode = #tpu.pipeline_mode<synchronous>, transform_indices = @transform_8, window_bounds = array<i64: 1, 1>}, {transform_indices = @transform_9, window_bounds = array<i64: 1, 1024>}]} {
    %c0 = arith.constant 0 : index
    %c0_0 = arith.constant 0 : index
    %0 = vector.load %arg1[%c0, %c0_0] : memref<2x1024xf32, #tpu.memory_space<vmem>>, vector<2x1024xf32>
    %c0_1 = arith.constant 0 : index
    %c0_2 = arith.constant 0 : index
    %1 = vector.load %arg2[%c0_1, %c0_2] : memref<32x2xf32, #tpu.memory_space<vmem>>, vector<32x2xf32>
    %c0_3 = arith.constant 0 : index
    %c0_4 = arith.constant 0 : index
    %2 = vector.load %arg3[%c0_3, %c0_4] : memref<32x1xf32, #tpu.memory_space<vmem>>, vector<32x1xf32>
    %cst = arith.constant dense<0.000000e+00> : vector<32x1024xf32>
    %3 = tpu.matmul %1, %0, %cst {dimension_numbers = #tpu.dot_dimension_numbers<[1], [0], [0], [1], [0, 0, 1, 1], [], []>} : vector<32x2xf32>, vector<2x1024xf32>, vector<32x1024xf32> -> vector<32x1024xf32>
    %4 = vector.broadcast %2 : vector<32x1xf32> to vector<32x1024xf32>
    %5 = arith.addf %3, %4 : vector<32x1024xf32>
    %6 = math.tanh %5 : vector<32x1024xf32>
    %c0_5 = arith.constant 0 : index
    %c0_6 = arith.constant 0 : index
    %7 = vector.load %arg4[%c0_5, %c0_6] : memref<32x32xf32, #tpu.memory_space<vmem>>, vector<32x32xf32>
    %c0_7 = arith.constant 0 : index
    %c0_8 = arith.constant 0 : index
    %8 = vector.load %arg5[%c0_7, %c0_8] : memref<32x1xf32, #tpu.memory_space<vmem>>, vector<32x1xf32>
    %cst_9 = arith.constant dense<0.000000e+00> : vector<32x1024xf32>
    %9 = tpu.matmul %7, %6, %cst_9 {dimension_numbers = #tpu.dot_dimension_numbers<[1], [0], [0], [1], [0, 0, 1, 1], [], []>} : vector<32x32xf32>, vector<32x1024xf32>, vector<32x1024xf32> -> vector<32x1024xf32>
    %10 = vector.broadcast %8 : vector<32x1xf32> to vector<32x1024xf32>
    %11 = arith.addf %9, %10 : vector<32x1024xf32>
    %12 = math.tanh %11 : vector<32x1024xf32>
    %c0_10 = arith.constant 0 : index
    %c0_11 = arith.constant 0 : index
    %13 = vector.load %arg6[%c0_10, %c0_11] : memref<32x32xf32, #tpu.memory_space<vmem>>, vector<32x32xf32>
    %c0_12 = arith.constant 0 : index
    %c0_13 = arith.constant 0 : index
    %14 = vector.load %arg7[%c0_12, %c0_13] : memref<32x1xf32, #tpu.memory_space<vmem>>, vector<32x1xf32>
    %cst_14 = arith.constant dense<0.000000e+00> : vector<32x1024xf32>
    %15 = tpu.matmul %13, %12, %cst_14 {dimension_numbers = #tpu.dot_dimension_numbers<[1], [0], [0], [1], [0, 0, 1, 1], [], []>} : vector<32x32xf32>, vector<32x1024xf32>, vector<32x1024xf32> -> vector<32x1024xf32>
    %16 = vector.broadcast %14 : vector<32x1xf32> to vector<32x1024xf32>
    %17 = arith.addf %15, %16 : vector<32x1024xf32>
    %18 = math.tanh %17 : vector<32x1024xf32>
    %c0_15 = arith.constant 0 : index
    %c0_16 = arith.constant 0 : index
    %19 = vector.load %arg8[%c0_15, %c0_16] : memref<1x32xf32, #tpu.memory_space<vmem>>, vector<1x32xf32>
    %c0_17 = arith.constant 0 : index
    %c0_18 = arith.constant 0 : index
    %20 = vector.load %arg9[%c0_17, %c0_18] : memref<1x1xf32, #tpu.memory_space<vmem>>, vector<1x1xf32>
    %cst_19 = arith.constant dense<0.000000e+00> : vector<1x1024xf32>
    %21 = tpu.matmul %19, %18, %cst_19 {dimension_numbers = #tpu.dot_dimension_numbers<[1], [0], [0], [1], [0, 0, 1, 1], [], []>} : vector<1x32xf32>, vector<32x1024xf32>, vector<1x1024xf32> -> vector<1x1024xf32>
    %22 = vector.broadcast %20 : vector<1x1xf32> to vector<1x1024xf32>
    %23 = arith.addf %21, %22 : vector<1x1024xf32>
    %c0_20 = arith.constant 0 : index
    %c0_21 = arith.constant 0 : index
    %24 = vector.load %arg10[%c0_20, %c0_21] : memref<1x1024xf32, #tpu.memory_space<vmem>>, vector<1x1024xf32>
    tpu.vector_store %arg10[%c0_20, %c0_21], %23 {strides = array<i32>} : memref<1x1024xf32, #tpu.memory_space<vmem>>, vector<1x1024xf32>,
    return
  }
  func.func @transform_0(%arg0: i32) -> (i32, i32) {
    %c0_i32 = arith.constant 0 : i32
    %c0_i32_0 = arith.constant 0 : i32
    return %c0_i32, %arg0 : i32, i32
  }
  func.func @transform_1(%arg0: i32) -> (i32, i32) {
    %c0_i32 = arith.constant 0 : i32
    %c0_i32_0 = arith.constant 0 : i32
    %c0_i32_1 = arith.constant 0 : i32
    return %c0_i32, %c0_i32_0 : i32, i32
  }
  func.func @transform_2(%arg0: i32) -> (i32, i32) {
    %c0_i32 = arith.constant 0 : i32
    %c0_i32_0 = arith.constant 0 : i32
    %c0_i32_1 = arith.constant 0 : i32
    return %c0_i32, %c0_i32_0 : i32, i32
  }
  func.func @transform_3(%arg0: i32) -> (i32, i32) {
    %c0_i32 = arith.constant 0 : i32
    %c0_i32_0 = arith.constant 0 : i32
    %c0_i32_1 = arith.constant 0 : i32
    return %c0_i32, %c0_i32_0 : i32, i32
  }
  func.func @transform_4(%arg0: i32) -> (i32, i32) {
    %c0_i32 = arith.constant 0 : i32
    %c0_i32_0 = arith.constant 0 : i32
    %c0_i32_1 = arith.constant 0 : i32
    return %c0_i32, %c0_i32_0 : i32, i32
  }
  func.func @transform_5(%arg0: i32) -> (i32, i32) {
    %c0_i32 = arith.constant 0 : i32
    %c0_i32_0 = arith.constant 0 : i32
    %c0_i32_1 = arith.constant 0 : i32
    return %c0_i32, %c0_i32_0 : i32, i32
  }
  func.func @transform_6(%arg0: i32) -> (i32, i32) {
    %c0_i32 = arith.constant 0 : i32
    %c0_i32_0 = arith.constant 0 : i32
    %c0_i32_1 = arith.constant 0 : i32
    return %c0_i32, %c0_i32_0 : i32, i32
  }
  func.func @transform_7(%arg0: i32) -> (i32, i32) {
    %c0_i32 = arith.constant 0 : i32
    %c0_i32_0 = arith.constant 0 : i32
    %c0_i32_1 = arith.constant 0 : i32
    return %c0_i32, %c0_i32_0 : i32, i32
  }
  func.func @transform_8(%arg0: i32) -> (i32, i32) {
    %c0_i32 = arith.constant 0 : i32
    %c0_i32_0 = arith.constant 0 : i32
    %c0_i32_1 = arith.constant 0 : i32
    return %c0_i32, %c0_i32_0 : i32, i32
  }
  func.func @transform_9(%arg0: i32) -> (i32, i32) {
    %c0_i32 = arith.constant 0 : i32
    %c0_i32_0 = arith.constant 0 : i32
    return %c0_i32, %arg0 : i32, i32
  }
}

</mosaic_0001>

<bundles_post_ra>
// kernel: _net_forward_pallas_t.1
= control target key start
LH: loop header
LB: loop body
LE: loop exit
PB: predicated region body
PF: predicated region fallthrough
CT: control target
= control target key end

     0   :  { %s2031_s0 = inlined_call_operand.vmem [shape: f32[2,1000], index: 0, kind: input, shape index: {}]   ;;  %s2032_s1 = inlined_call_operand.vmem [shape: f32[32,2], index: 1, kind: input, shape index: {}]   ;;  %s2033_s2 = inlined_call_operand.vmem [shape: f32[32,1], index: 2, kind: input, shape index: {}]   ;;  %s2034_s3 = inlined_call_operand.vmem [shape: f32[32,32], index: 3, kind: input, shape index: {}]   ;;  %s2035_s4 = inlined_call_operand.vmem [shape: f32[32,1], index: 4, kind: input, shape index: {}]   ;;  %s2036_s5 = inlined_call_operand.vmem [shape: f32[32,32], index: 5, kind: input, shape index: {}]   ;;  %s2037_s6 = inlined_call_operand.vmem [shape: f32[32,1], index: 6, kind: input, shape index: {}]   ;;  %s2038_s7 = inlined_call_operand.vmem [shape: f32[1,32], index: 7, kind: input, shape index: {}]   ;;  %s2039_s8 = inlined_call_operand.<no memory space> [shape: f32[1,1], index: 8, kind: input, shape index: {}]   ;;  %s2040_s9 = inlined_call_operand.hbm [shape: f32[1,1000], index: 9, kind: output, shape index: {}]  }
   0x1   :  { %v14_v0 = vstv %s2039_s8 }
   0x2   :  { %15 = vst [vmem:[#allocation2] sm:$0x1] %v14_v0 }
   0x3   :  { %v35_v1 = vld [vmem:[%s2031_s0] sm:$0xff]  ;;  %v44_v2 = vld [vmem:[%s2033_s2 + $0x18] sm:$0xff]  ;;  %v1533_v3 = vmov 0   ;;  %v42_v4 = vld [vmem:[%s2033_s2 + $0x8] sm:$0xff] }
   0x4   :  { %67 = vst [vmem:[#allocation1] ss:$4 sm:$0xff] %v35_v1  ;;  %1312 = vset.pattern.permute.xlu0 %v1533_v3  ;;  %1313 = vset.pattern.permute.xlu1 %v1533_v3  ;;  %v36_v5 = vld [vmem:[%s2031_s0 + $0x8] sm:$0xff] }
   0x5   :  { %62 = vperm.xlu0 %1312, %v44_v2   ;;  %52 = vperm.xlu1 %1313, %v42_v4  }
   0x6   :  { %1314 = vset.pattern.permute.xlu2 %v1533_v3 }
   0x7   :  { %16 = vsyncpa [#allocation4], 0  ;;  %69 = vst [vmem:[#allocation1 + $0x20] ss:$4 sm:$0xff] %v36_v5  ;;  %vm91_vm0 = vcmask 1041408   ;;  %v37_v6 = vld [vmem:[%s2032_s1] sm:$0xff] }
   0x8   :  { %vm78_vm1 = vcmask 15360   ;;  %v43_v11 = vld [vmem:[%s2033_s2 + $0x10] sm:$0xff]  ;;  %v41_v12 = vld [vmem:[%s2033_s2] sm:$0xff]  ;;  %v38_v17 = vld [vmem:[%s2032_s1 + $0x8] sm:$0xff]  ;;  %vm400_vm2 = vcmask 261120   ;;  %vm1169_vm3 = vcmask 1042434  }
   0x9   :  { %v377_v18 = vld [vmem:[%s2035_s4 + $0x8] sm:$0xff]  ;;  %v376_v19 = vld [vmem:[%s2035_s4] sm:$0xff]  ;;  %v39_v20 = vld [vmem:[%s2032_s1 + $0x10] sm:$0xff]  ;;  %vm1167_vm4 = vcmask 1040384   ;;  %vm1172_vm5 = vcmask 1044484   ;;  %vm1174_vm6 = vcmask 1046534  }
   0xa   :  { %v683_v21 = vld [vmem:[%s2037_s6 + $0x10] sm:$0xff]  ;;  %v682_v22 = vld [vmem:[%s2037_s6 + $0x8] sm:$0xff]  ;;  %v40_v23 = vld [vmem:[%s2032_s1 + $0x18] sm:$0xff]  ;;  %vm1176_vm7 = vcmask 1045508   ;;  %s1189_s1 = sshll.u32 %s2040_s9, 4  ;;  %vm1178_vm8 = vcmask 1043456   ;;  %s1190_s1 = int_to_ptr.hbm [resolvable:$true] %s1189_s1 }
   0xb   :  { %v70_v7 = vld.sshfl [vmem:[#allocation1] sm:$0xff pattern:$0x73625140]  ;;  %v71_v8 = vld.sshfl [vmem:[#allocation1 + $0x8] sm:$0xff pattern:$0x73625140] }
   0xc   :  { %1198 = vmatpush.msk.msra.mxu0 %vm91_vm0, %v70_v7  ;;  %1203 = vmatpush.msk.msra.mxu1 %vm91_vm0, %v71_v8  ;;  %v72_v9 = vld.sshfl [vmem:[#allocation1 + $0x10] sm:$0xff pattern:$0x73625140]  ;;  %v73_v10 = vld.sshfl [vmem:[#allocation1 + $0x18] sm:$0xff pattern:$0x73625140] }
   0xd   :  { %1208 = vmatpush.msk.msra.mxu2 %vm91_vm0, %v72_v9  ;;  %1213 = vmatpush.msk.msra.mxu3 %vm91_vm0, %v73_v10  ;;  %v982_v24 = vld [vmem:[#allocation2] sm:$0x1] }
   0xe   :  { %1199 = vmatmul.msk.f32.vlgmr.msra.gmra.mxu0 %vm78_vm1, %v37_v6  ;;  %1204 = vmatmul.msk.f32.vlgmr.msra.gmra.mxu1 %vm78_vm1, %v37_v6  ;;  %v76_v13 = vld.sshfl [vmem:[#allocation1 + $0x30] sm:$0xff pattern:$0x73625140]  ;;  %v77_v14 = vld.sshfl [vmem:[#allocation1 + $0x38] sm:$0xff pattern:$0x73625140] }
   0xf   :  { %1209 = vmatmul.msk.f32.vlgmr.msra.gmra.mxu2 %vm78_vm1, %v37_v6  ;;  %1214 = vmatmul.msk.f32.vlgmr.msra.gmra.mxu3 %vm78_vm1, %v37_v6  ;;  %v74_v15 = vld.sshfl [vmem:[#allocation1 + $0x20] sm:$0xff pattern:$0x73625140]  ;;  %v75_v16 = vld.sshfl [vmem:[#allocation1 + $0x28] sm:$0xff pattern:$0x73625140] }
  0x10   :  { %57 = vperm.xlu0 %1312, %v43_v11   ;;  %47 = vperm.xlu1 %1313, %v41_v12   ;;  %v1705_v12 = vld [vmem:[%s2034_s3] sm:$0xff] }
  0x11   :  { %1228 = vmatpush.msk.msrb.mxu2 %vm91_vm0, %v76_v13  ;;  %1233 = vmatpush.msk.msrb.mxu3 %vm91_vm0, %v77_v14 }
  0x12   :  { %1218 = vmatpush.msk.msrb.mxu0 %vm91_vm0, %v74_v15  ;;  %1223 = vmatpush.msk.msrb.mxu1 %vm91_vm0, %v75_v16 }
  0x16   :  { %1200 = vmatmul.msk.f32.gmra.mxu0 %vm78_vm1, %v38_v17  ;;  %1205 = vmatmul.msk.f32.gmra.mxu1 %vm78_vm1, %v38_v17 }
  0x17   :  { %1210 = vmatmul.msk.f32.gmra.mxu2 %vm78_vm1, %v38_v17  ;;  %1215 = vmatmul.msk.f32.gmra.mxu3 %vm78_vm1, %v38_v17 }
  0x18   :  { %387 = vperm.xlu0 %1312, %v377_v18   ;;  %382 = vperm.xlu1 %1313, %v376_v19  }
  0x1e   :  { %1201 = vmatmul.msk.f32.gmra.mxu0 %vm78_vm1, %v39_v20  ;;  %1206 = vmatmul.msk.f32.gmra.mxu1 %vm78_vm1, %v39_v20 }
  0x1f   :  { %1211 = vmatmul.msk.f32.gmra.mxu2 %vm78_vm1, %v39_v20  ;;  %1216 = vmatmul.msk.f32.gmra.mxu3 %vm78_vm1, %v39_v20 }
  0x20   :  { %697 = vperm.xlu0 %1312, %v683_v21   ;;  %692 = vperm.xlu1 %1313, %v682_v22  }
  0x26   :  { %1202 = vmatmul.msk.f32.gmra.mxu0 %vm78_vm1, %v40_v23  ;;  %1207 = vmatmul.msk.f32.gmra.mxu1 %vm78_vm1, %v40_v23 }
  0x27   :  { %1212 = vmatmul.msk.f32.gmra.mxu2 %vm78_vm1, %v40_v23  ;;  %1217 = vmatmul.msk.f32.gmra.mxu3 %vm78_vm1, %v40_v23 }
  0x28   :  { %985 = vperm.xlu0 %1312, %v982_v24   ;;  %v1714_v24 = vld [vmem:[%s2034_s3 + $0x8] sm:$0xff] }
  0x2e   :  { %1219 = vmatmul.msk.f32.vlgmr.msrb.gmra.mxu0 %vm78_vm1, %v37_v6  ;;  %1224 = vmatmul.msk.f32.vlgmr.msrb.gmra.mxu1 %vm78_vm1, %v37_v6 }
  0x2f   :  { %1229 = vmatmul.msk.f32.vlgmr.msrb.gmra.mxu2 %vm78_vm1, %v37_v6  ;;  %1234 = vmatmul.msk.f32.vlgmr.msrb.gmra.mxu3 %vm78_vm1, %v37_v6 }
  0x36   :  { %1220 = vmatmul.msk.f32.gmra.mxu0 %vm78_vm1, %v38_v17  ;;  %1225 = vmatmul.msk.f32.gmra.mxu1 %vm78_vm1, %v38_v17 }
  0x37   :  { %1230 = vmatmul.msk.f32.gmra.mxu2 %vm78_vm1, %v38_v17  ;;  %1235 = vmatmul.msk.f32.gmra.mxu3 %vm78_vm1, %v38_v17 }
  0x3e   :  { %1221 = vmatmul.msk.f32.gmra.mxu0 %vm78_vm1, %v39_v20  ;;  %1226 = vmatmul.msk.f32.gmra.mxu1 %vm78_vm1, %v39_v20 }
  0x3f   :  { %1231 = vmatmul.msk.f32.gmra.mxu2 %vm78_vm1, %v39_v20  ;;  %1236 = vmatmul.msk.f32.gmra.mxu3 %vm78_vm1, %v39_v20 }
  0x46   :  { %1222 = vmatmul.msk.f32.gmra.mxu0 %vm78_vm1, %v40_v23  ;;  %1227 = vmatmul.msk.f32.gmra.mxu1 %vm78_vm1, %v40_v23 }
  0x47   :  { %1232 = vmatmul.msk.f32.gmra.mxu2 %vm78_vm1, %v40_v23  ;;  %1237 = vmatmul.msk.f32.gmra.mxu3 %vm78_vm1, %v40_v23 }
  0x77   :  { %v1670_v31 = vpop.permute.xlu0 %62  ;;  %v1672_v36 = vpop.permute.xlu1 %52 }
  0x82   :  { %v1676_v43 = vpop.permute.xlu0 %57  ;;  %v1681_v47 = vpop.permute.xlu1 %47 }
  0x8b   :  { %v125_v25 = vpop.f32.mrf.mxu0  ;;  %v154_v26 = vpop.f32.mrf.mxu1 }
  0x8c   :  { %v126_v49 = vadd.f32 %v125_v25, %v1681_v47  ;;  %v155_v50 = vadd.f32 %v154_v26, %v1681_v47  ;;  %v379_v25 = vld [vmem:[%s2035_s4 + $0x18] sm:$0xff] }
  0x8d   :  { %397 = vperm.xlu2 %1314, %v379_v25  }
  0x92   :  { %v183_v27 = vpop.f32.mrf.mxu2  ;;  %v212_v28 = vpop.f32.mrf.mxu3 }
  0x93   :  { %v128_v29 = vpop.f32.mrf.mxu0  ;;  %v157_v30 = vpop.f32.mrf.mxu1  ;;  %v184_v2 = vadd.f32 %v183_v27, %v1681_v47  ;;  %v213_v4 = vadd.f32 %v212_v28, %v1681_v47 }
  0x94   :  { %v129_v37 = vadd.f32 %v128_v29, %v1672_v36  ;;  %v158_v38 = vadd.f32 %v157_v30, %v1672_v36 }
  0x96   :  { %1315 = vtanh.f32 %v129_v37 }
  0x97   :  { %1317 = vtanh.f32 %v158_v38 }
  0x9a   :  { %v186_v32 = vpop.f32.mrf.mxu2  ;;  %v215_v33 = vpop.f32.mrf.mxu3 }
  0x9b   :  { %v131_v34 = vpop.f32.mrf.mxu0  ;;  %v160_v35 = vpop.f32.mrf.mxu1  ;;  %v187_v62 = vadd.f32 %v186_v32, %v1672_v36  ;;  %v216_v0 = vadd.f32 %v215_v33, %v1672_v36  ;;  %v1734_v33 = vld [vmem:[%s2034_s3 + $0x10] sm:$0xff] }
  0x9c   :  { %v132_v46 = vadd.f32 %v131_v34, %v1676_v43  ;;  %v161_v48 = vadd.f32 %v160_v35, %v1676_v43  ;;  %v1316_v53 = vpop.eup %1315 }
  0x9d   :  { %v1318_v59 = vpop.eup %1317 }
  0xa2   :  { %v189_v39 = vpop.f32.mrf.mxu2  ;;  %v218_v40 = vpop.f32.mrf.mxu3 }
  0xa3   :  { %v134_v41 = vpop.f32.mrf.mxu0  ;;  %v163_v42 = vpop.f32.mrf.mxu1  ;;  %v190_v54 = vadd.f32 %v189_v39, %v1676_v43  ;;  %v219_v60 = vadd.f32 %v218_v40, %v1676_v43  ;;  %v378_v40 = vld [vmem:[%s2035_s4 + $0x10] sm:$0xff] }
  0xa4   :  { %v135_v44 = vadd.f32 %v134_v41, %v1670_v31  ;;  %v164_v45 = vadd.f32 %v163_v42, %v1670_v31  ;;  %392 = vperm.xlu2 %1314, %v378_v40  }
  0xa6   :  { %1319 = vtanh.f32 %v135_v44 }
  0xa7   :  { %1321 = vtanh.f32 %v164_v45 }
  0xa8   :  { %1323 = vtanh.f32 %v132_v46 }
  0xa9   :  { %1325 = vtanh.f32 %v161_v48 }
  0xaa   :  { %v192_v51 = vpop.f32.mrf.mxu2  ;;  %v221_v52 = vpop.f32.mrf.mxu3  ;;  %1327 = vtanh.f32 %v126_v49  ;;  %v1758_v49 = vld [vmem:[%s2034_s3 + $0x18] sm:$0xff] }
  0xab   :  { %v193_v55 = vadd.f32 %v192_v51, %v1670_v31  ;;  %v222_v56 = vadd.f32 %v221_v52, %v1670_v31  ;;  %v1689_v57 = vpop.f32.mrf.mxu0  ;;  %v1691_v58 = vpop.f32.mrf.mxu1  ;;  %1329 = vtanh.f32 %v155_v50 }
  0xac   :  { %v1320_v61 = vpop.eup %1319  ;;  %v242_v26 = vadd.f32 %v1689_v57, %v1681_v47  ;;  %v271_v27 = vadd.f32 %v1691_v58, %v1681_v47 }
  0xad   :  { %1331 = vtanh.f32 %v193_v55  ;;  %v1322_v63 = vpop.eup %1321  ;;  %425 = vmatpush.msra.mxu0 %v1320_v61 }
  0xae   :  { %1333 = vtanh.f32 %v222_v56  ;;  %v1324_v1 = vpop.eup %1323  ;;  %454 = vmatpush.msra.mxu1 %v1322_v63  ;;  %v681_v63 = vld [vmem:[%s2037_s6] sm:$0xff] }
  0xaf   :  { %1335 = vtanh.f32 %v190_v54  ;;  %v1326_v3 = vpop.eup %1325  ;;  %426 = vmatpush.msra.mxu0 %v1324_v1 }
  0xb0   :  { %1337 = vtanh.f32 %v219_v60  ;;  %v1328_v5 = vpop.eup %1327  ;;  %455 = vmatpush.msra.mxu1 %v1326_v3 }
  0xb1   :  { %1339 = vtanh.f32 %v187_v62  ;;  %v1330_v6 = vpop.eup %1329  ;;  %427 = vmatpush.msra.mxu0 %v1316_v53 }
  0xb2   :  { %1341 = vtanh.f32 %v216_v0  ;;  %v1698_v7 = vpop.f32.mrf.mxu2  ;;  %v1700_v8 = vpop.f32.mrf.mxu3  ;;  %456 = vmatpush.msra.mxu1 %v1318_v59 }
  0xb3   :  { %v1332_v9 = vpop.eup %1331  ;;  %1343 = vtanh.f32 %v184_v2  ;;  %v244_v10 = vpop.f32.mrf.mxu0  ;;  %428 = vmatpush.msra.mxu0 %v1328_v5  ;;  %v300_v58 = vadd.f32 %v1698_v7, %v1681_v47  ;;  %v329_v60 = vadd.f32 %v1700_v8, %v1681_v47 }
  0xb4   :  { %v273_v11 = vpop.f32.mrf.mxu1  ;;  %v1334_v13 = vpop.eup %1333  ;;  %1345 = vtanh.f32 %v213_v4  ;;  %483 = vmatpush.msra.mxu2 %v1332_v9  ;;  %457 = vmatpush.msra.mxu1 %v1330_v6  ;;  %v245_v39 = vadd.f32 %v244_v10, %v1672_v36 }
  0xb5   :  { %v1336_v14 = vpop.eup %1335  ;;  %512 = vmatpush.msra.mxu3 %v1334_v13  ;;  %1238 = vmatmul.msk.f32.vlgmr.msra.gmra.mxu0 %vm400_vm2, %v1705_v12  ;;  %1347 = vtanh.f32 %v242_v26  ;;  %v274_v41 = vadd.f32 %v273_v11, %v1672_v36 }
  0xb6   :  { %v1338_v15 = vpop.eup %1337  ;;  %1242 = vmatmul.msk.f32.vlgmr.msra.gmra.mxu1 %vm400_vm2, %v1705_v12  ;;  %484 = vmatpush.msra.mxu2 %v1336_v14  ;;  %1349 = vtanh.f32 %v271_v27 }
  0xb7   :  { %v1340_v16 = vpop.eup %1339  ;;  %513 = vmatpush.msra.mxu3 %v1338_v15 }
  0xb8   :  { %v1342_v17 = vpop.eup %1341  ;;  %485 = vmatpush.msra.mxu2 %v1340_v16 }
  0xb9   :  { %v1344_v18 = vpop.eup %1343  ;;  %514 = vmatpush.msra.mxu3 %v1342_v17 }
  0xba   :  { %v1346_v19 = vpop.eup %1345  ;;  %v302_v20 = vpop.f32.mrf.mxu2  ;;  %486 = vmatpush.msra.mxu2 %v1344_v18 }
  0xbb   :  { %v331_v21 = vpop.f32.mrf.mxu3  ;;  %515 = vmatpush.msra.mxu3 %v1346_v19  ;;  %v247_v22 = vpop.f32.mrf.mxu0  ;;  %1246 = vmatmul.msk.f32.vlgmr.msra.gmra.mxu2 %vm400_vm2, %v1705_v12  ;;  %v303_v54 = vadd.f32 %v302_v20, %v1672_v36 }
  0xbc   :  { %v276_v23 = vpop.f32.mrf.mxu1  ;;  %1250 = vmatmul.msk.f32.vlgmr.msra.gmra.mxu3 %vm400_vm2, %v1705_v12  ;;  %v248_v37 = vadd.f32 %v247_v22, %v1676_v43  ;;  %v1348_v45 = vpop.eup %1347  ;;  %v332_v56 = vadd.f32 %v331_v21, %v1672_v36 }
  0xbd   :  { %1239 = vmatmul.msk.f32.gmra.mxu0 %vm400_vm2, %v1714_v24  ;;  %v277_v38 = vadd.f32 %v276_v23, %v1676_v43  ;;  %v1350_v50 = vpop.eup %1349  ;;  %v1826_v23 = vpop.permute.xlu0 %387 }
  0xbe   :  { %1243 = vmatmul.msk.f32.gmra.mxu1 %vm400_vm2, %v1714_v24 }
  0xc2   :  { %v305_v28 = vpop.f32.mrf.mxu2 }
  0xc3   :  { %v334_v29 = vpop.f32.mrf.mxu3  ;;  %v250_v30 = vpop.f32.mrf.mxu0  ;;  %1247 = vmatmul.msk.f32.gmra.mxu2 %vm400_vm2, %v1714_v24  ;;  %v306_v51 = vadd.f32 %v305_v28, %v1676_v43 }
  0xc4   :  { %v279_v32 = vpop.f32.mrf.mxu1  ;;  %1251 = vmatmul.msk.f32.gmra.mxu3 %vm400_vm2, %v1714_v24  ;;  %v251_v34 = vadd.f32 %v250_v30, %v1670_v31  ;;  %v335_v53 = vadd.f32 %v334_v29, %v1676_v43  ;;  %v684_v43 = vld [vmem:[%s2037_s6 + $0x18] sm:$0xff] }
  0xc5   :  { %v280_v35 = vadd.f32 %v279_v32, %v1670_v31  ;;  %1240 = vmatmul.msk.f32.gmra.mxu0 %vm400_vm2, %v1734_v33  ;;  %702 = vperm.xlu2 %1314, %v684_v43  }
  0xc6   :  { %1244 = vmatmul.msk.f32.gmra.mxu1 %vm400_vm2, %v1734_v33  ;;  %1351 = vtanh.f32 %v251_v34 }
  0xc7   :  { %1353 = vtanh.f32 %v280_v35 }
  0xc8   :  { %1355 = vtanh.f32 %v248_v37 }
  0xc9   :  { %1357 = vtanh.f32 %v277_v38 }
  0xca   :  { %v308_v42 = vpop.f32.mrf.mxu2  ;;  %1359 = vtanh.f32 %v245_v39 }
  0xcb   :  { %v337_v44 = vpop.f32.mrf.mxu3  ;;  %v309_v46 = vadd.f32 %v308_v42, %v1670_v31  ;;  %1361 = vtanh.f32 %v274_v41  ;;  %1248 = vmatmul.msk.f32.gmra.mxu2 %vm400_vm2, %v1734_v33 }
  0xcc   :  { %v338_v48 = vadd.f32 %v337_v44, %v1670_v31  ;;  %1252 = vmatmul.msk.f32.gmra.mxu3 %vm400_vm2, %v1734_v33  ;;  %v1352_v52 = vpop.eup %1351 }
  0xcd   :  { %1363 = vtanh.f32 %v309_v46  ;;  %v1354_v31 = vpop.eup %1353  ;;  %1241 = vmatmul.msk.f32.gmra.mxu0 %vm400_vm2, %v1758_v49  ;;  %687 = vperm.xlu2 %1314, %v681_v63  }
  0xce   :  { %1365 = vtanh.f32 %v338_v48  ;;  %1245 = vmatmul.msk.f32.gmra.mxu1 %vm400_vm2, %v1758_v49  ;;  %v1356_v55 = vpop.eup %1355  ;;  %541 = vmatpush.msrb.mxu0 %v1352_v52 }
  0xcf   :  { %570 = vmatpush.msrb.mxu1 %v1354_v31  ;;  %v1358_v57 = vpop.eup %1357  ;;  %1367 = vtanh.f32 %v306_v51 }
  0xd0   :  { %v1360_v59 = vpop.eup %1359  ;;  %1369 = vtanh.f32 %v335_v53  ;;  %542 = vmatpush.msrb.mxu0 %v1356_v55 }
  0xd1   :  { %571 = vmatpush.msrb.mxu1 %v1358_v57  ;;  %v1362_v36 = vpop.eup %1361  ;;  %1371 = vtanh.f32 %v303_v54 }
  0xd2   :  { %1373 = vtanh.f32 %v332_v56  ;;  %543 = vmatpush.msrb.mxu0 %v1360_v59 }
  0xd3   :  { %v1364_v61 = vpop.eup %1363  ;;  %572 = vmatpush.msrb.mxu1 %v1362_v36  ;;  %1375 = vtanh.f32 %v300_v58  ;;  %1249 = vmatmul.msk.f32.gmra.mxu2 %vm400_vm2, %v1758_v49 }
  0xd4   :  { %v1366_v62 = vpop.eup %1365  ;;  %1253 = vmatmul.msk.f32.gmra.mxu3 %vm400_vm2, %v1758_v49  ;;  %1377 = vtanh.f32 %v329_v60  ;;  %544 = vmatpush.msrb.mxu0 %v1348_v45  ;;  %v1862_v60 = vld [vmem:[%s2036_s5 + $0x8] sm:$0xff] }
  0xd5   :  { %573 = vmatpush.msrb.mxu1 %v1350_v50  ;;  %v1368_v47 = vpop.eup %1367  ;;  %599 = vmatpush.msrb.mxu2 %v1364_v61 }
  0xd6   :  { %628 = vmatpush.msrb.mxu3 %v1366_v62  ;;  %v1370_v0 = vpop.eup %1369  ;;  %1254 = vmatmul.msk.f32.vlgmr.msrb.gmra.mxu0 %vm400_vm2, %v1705_v12 }
  0xd7   :  { %1258 = vmatmul.msk.f32.vlgmr.msrb.gmra.mxu1 %vm400_vm2, %v1705_v12  ;;  %v1372_v1 = vpop.eup %1371  ;;  %600 = vmatpush.msrb.mxu2 %v1368_v47 }
  0xd8   :  { %629 = vmatpush.msrb.mxu3 %v1370_v0  ;;  %v1374_v2 = vpop.eup %1373 }
  0xd9   :  { %v1376_v3 = vpop.eup %1375  ;;  %601 = vmatpush.msrb.mxu2 %v1372_v1 }
  0xda   :  { %630 = vmatpush.msrb.mxu3 %v1374_v2  ;;  %v1378_v4 = vpop.eup %1377 }
  0xdb   :  { %602 = vmatpush.msrb.mxu2 %v1376_v3 }
  0xdc   :  { %631 = vmatpush.msrb.mxu3 %v1378_v4  ;;  %1262 = vmatmul.msk.f32.vlgmr.msrb.gmra.mxu2 %vm400_vm2, %v1705_v12 }
  0xdd   :  { %1266 = vmatmul.msk.f32.vlgmr.msrb.gmra.mxu3 %vm400_vm2, %v1705_v12 }
  0xde   :  { %1255 = vmatmul.msk.f32.gmra.mxu0 %vm400_vm2, %v1714_v24 }
  0xdf   :  { %1259 = vmatmul.msk.f32.gmra.mxu1 %vm400_vm2, %v1714_v24 }
  0xe4   :  { %1263 = vmatmul.msk.f32.gmra.mxu2 %vm400_vm2, %v1714_v24 }
  0xe5   :  { %1267 = vmatmul.msk.f32.gmra.mxu3 %vm400_vm2, %v1714_v24  ;;  %v1828_v24 = vpop.permute.xlu1 %382 }
  0xe6   :  { %1256 = vmatmul.msk.f32.gmra.mxu0 %vm400_vm2, %v1734_v33 }
  0xe7   :  { %1260 = vmatmul.msk.f32.gmra.mxu1 %vm400_vm2, %v1734_v33  ;;  %v1818_v9 = vpop.permute.xlu2 %397 }
  0xec   :  { %1264 = vmatmul.msk.f32.gmra.mxu2 %vm400_vm2, %v1734_v33 }
  0xed   :  { %1268 = vmatmul.msk.f32.gmra.mxu3 %vm400_vm2, %v1734_v33 }
  0xee   :  { %1257 = vmatmul.msk.f32.gmra.mxu0 %vm400_vm2, %v1758_v49 }
  0xef   :  { %1261 = vmatmul.msk.f32.gmra.mxu1 %vm400_vm2, %v1758_v49 }
  0xf4   :  { %1265 = vmatmul.msk.f32.gmra.mxu2 %vm400_vm2, %v1758_v49 }
  0xf5   :  { %1269 = vmatmul.msk.f32.gmra.mxu3 %vm400_vm2, %v1758_v49  ;;  %v1845_v49 = vld [vmem:[%s2036_s5] sm:$0xff] }
  0xfe   :  { %v1820_v14 = vpop.permute.xlu2 %392 }
 0x132   :  { %v430_v5 = vpop.f32.mrf.mxu0 }
 0x133   :  { %v459_v6 = vpop.f32.mrf.mxu1  ;;  %v431_v29 = vadd.f32 %v430_v5, %v1828_v24  ;;  %v1875_v5 = vld [vmem:[%s2036_s5 + $0x10] sm:$0xff] }
 0x134   :  { %v460_v30 = vadd.f32 %v459_v6, %v1828_v24 }
 0x13a   :  { %v433_v7 = vpop.f32.mrf.mxu0 }
 0x13b   :  { %v462_v8 = vpop.f32.mrf.mxu1  ;;  %v434_v25 = vadd.f32 %v433_v7, %v1826_v23 }
 0x13c   :  { %v463_v26 = vadd.f32 %v462_v8, %v1826_v23 }
 0x13e   :  { %v488_v10 = vpop.f32.mrf.mxu2 }
 0x13f   :  { %v517_v11 = vpop.f32.mrf.mxu3  ;;  %v489_v31 = vadd.f32 %v488_v10, %v1828_v24 }
 0x140   :  { %v518_v56 = vadd.f32 %v517_v11, %v1828_v24 }
 0x142   :  { %v436_v12 = vpop.f32.mrf.mxu0 }
 0x143   :  { %v465_v13 = vpop.f32.mrf.mxu1  ;;  %v437_v17 = vadd.f32 %v436_v12, %v1820_v14 }
 0x144   :  { %v466_v18 = vadd.f32 %v465_v13, %v1820_v14 }
 0x145   :  { %1379 = vtanh.f32 %v437_v17 }
 0x146   :  { %v491_v15 = vpop.f32.mrf.mxu2  ;;  %1381 = vtanh.f32 %v466_v18 }
 0x147   :  { %v520_v16 = vpop.f32.mrf.mxu3  ;;  %v492_v51 = vadd.f32 %v491_v15, %v1826_v23 }
 0x148   :  { %v521_v53 = vadd.f32 %v520_v16, %v1826_v23 }
 0x14a   :  { %v439_v19 = vpop.f32.mrf.mxu0 }
 0x14b   :  { %v468_v20 = vpop.f32.mrf.mxu1  ;;  %v440_v21 = vadd.f32 %v439_v19, %v1818_v9  ;;  %v1380_v32 = vpop.eup %1379  ;;  %v1896_v19 = vld [vmem:[%s2036_s5 + $0x18] sm:$0xff] }
 0x14c   :  { %v469_v22 = vadd.f32 %v468_v20, %v1818_v9  ;;  %v1382_v33 = vpop.eup %1381 }
 0x14d   :  { %1383 = vtanh.f32 %v440_v21 }
 0x14e   :  { %1385 = vtanh.f32 %v469_v22  ;;  %v494_v27 = vpop.f32.mrf.mxu2 }
 0x14f   :  { %v523_v28 = vpop.f32.mrf.mxu3  ;;  %1387 = vtanh.f32 %v434_v25  ;;  %v495_v42 = vadd.f32 %v494_v27, %v1820_v14 }
 0x150   :  { %1389 = vtanh.f32 %v463_v26  ;;  %v524_v48 = vadd.f32 %v523_v28, %v1820_v14 }
 0x151   :  { %1391 = vtanh.f32 %v431_v29 }
 0x152   :  { %1393 = vtanh.f32 %v460_v30 }
 0x153   :  { %v1384_v34 = vpop.eup %1383  ;;  %v1834_v35 = vpop.f32.mrf.mxu0 }
 0x154   :  { %v1836_v37 = vpop.f32.mrf.mxu1  ;;  %v1386_v38 = vpop.eup %1385  ;;  %729 = vmatpush.msra.mxu0 %v1384_v34  ;;  %v547_v18 = vadd.f32 %v1834_v35, %v1828_v24 }
 0x155   :  { %758 = vmatpush.msra.mxu1 %v1386_v38  ;;  %v1388_v41 = vpop.eup %1387  ;;  %v576_v20 = vadd.f32 %v1836_v37, %v1828_v24 }
 0x156   :  { %v497_v39 = vpop.f32.mrf.mxu2  ;;  %730 = vmatpush.msra.mxu0 %v1380_v32  ;;  %v1390_v46 = vpop.eup %1389 }
 0x157   :  { %v526_v40 = vpop.f32.mrf.mxu3  ;;  %v498_v44 = vadd.f32 %v497_v39, %v1818_v9  ;;  %759 = vmatpush.msra.mxu1 %v1382_v33  ;;  %v1392_v50 = vpop.eup %1391 }
 0x158   :  { %v527_v45 = vadd.f32 %v526_v40, %v1818_v9  ;;  %731 = vmatpush.msra.mxu0 %v1388_v41  ;;  %v1394_v52 = vpop.eup %1393 }
 0x159   :  { %1395 = vtanh.f32 %v498_v44  ;;  %760 = vmatpush.msra.mxu1 %v1390_v46 }
 0x15a   :  { %1397 = vtanh.f32 %v527_v45  ;;  %732 = vmatpush.msra.mxu0 %v1392_v50 }
 0x15b   :  { %1399 = vtanh.f32 %v495_v42  ;;  %v549_v54 = vpop.f32.mrf.mxu0  ;;  %761 = vmatpush.msra.mxu1 %v1394_v52  ;;  %1270 = vmatmul.msk.f32.vlgmr.msra.gmra.mxu0 %vm400_vm2, %v1845_v49 }
 0x15c   :  { %v578_v55 = vpop.f32.mrf.mxu1  ;;  %1401 = vtanh.f32 %v524_v48  ;;  %1274 = vmatmul.msk.f32.vlgmr.msra.gmra.mxu1 %vm400_vm2, %v1845_v49  ;;  %v550_v13 = vadd.f32 %v549_v54, %v1826_v23  ;;  %v1954_v54 = vpop.permute.xlu2 %702 }
 0x15d   :  { %1403 = vtanh.f32 %v492_v51  ;;  %v579_v15 = vadd.f32 %v578_v55, %v1826_v23 }
 0x15e   :  { %1405 = vtanh.f32 %v521_v53 }
 0x15f   :  { %v1396_v43 = vpop.eup %1395  ;;  %1407 = vtanh.f32 %v489_v31  ;;  %v1855_v57 = vpop.f32.mrf.mxu2 }
 0x160   :  { %v1857_v58 = vpop.f32.mrf.mxu3  ;;  %v1398_v59 = vpop.eup %1397  ;;  %1409 = vtanh.f32 %v518_v56  ;;  %787 = vmatpush.msra.mxu2 %v1396_v43 }
 0x161   :  { %v1400_v36 = vpop.eup %1399  ;;  %816 = vmatpush.msra.mxu3 %v1398_v59  ;;  %v1956_v43 = vpop.permute.xlu0 %697 }
 0x162   :  { %v1402_v61 = vpop.eup %1401  ;;  %788 = vmatpush.msra.mxu2 %v1400_v36  ;;  %v1960_v36 = vpop.permute.xlu1 %692 }
 0x163   :  { %v1404_v62 = vpop.eup %1403  ;;  %v552_v47 = vpop.f32.mrf.mxu0  ;;  %817 = vmatpush.msra.mxu3 %v1402_v61  ;;  %1271 = vmatmul.msk.f32.gmra.mxu0 %vm400_vm2, %v1862_v60 }
 0x164   :  { %v581_v63 = vpop.f32.mrf.mxu1  ;;  %v1406_v0 = vpop.eup %1405  ;;  %1275 = vmatmul.msk.f32.gmra.mxu1 %vm400_vm2, %v1862_v60  ;;  %789 = vmatpush.msra.mxu2 %v1404_v62  ;;  %v553_v8 = vadd.f32 %v552_v47, %v1820_v14 }
 0x165   :  { %v1408_v1 = vpop.eup %1407  ;;  %818 = vmatpush.msra.mxu3 %v1406_v0  ;;  %v582_v12 = vadd.f32 %v581_v63, %v1820_v14 }
 0x166   :  { %v1410_v2 = vpop.eup %1409  ;;  %790 = vmatpush.msra.mxu2 %v1408_v1  ;;  %v1965_v1 = vpop.permute.xlu2 %687 }
 0x167   :  { %v607_v3 = vpop.f32.mrf.mxu2  ;;  %819 = vmatpush.msra.mxu3 %v1410_v2  ;;  %1278 = vmatmul.msk.f32.vlgmr.msra.gmra.mxu2 %vm400_vm2, %v1845_v49 }
 0x168   :  { %v636_v4 = vpop.f32.mrf.mxu3  ;;  %1282 = vmatmul.msk.f32.vlgmr.msra.gmra.mxu3 %vm400_vm2, %v1845_v49  ;;  %v608_v38 = vadd.f32 %v607_v3, %v1826_v23 }
 0x169   :  { %v637_v40 = vadd.f32 %v636_v4, %v1826_v23 }
 0x16b   :  { %v555_v6 = vpop.f32.mrf.mxu0  ;;  %1272 = vmatmul.msk.f32.gmra.mxu0 %vm400_vm2, %v1875_v5 }
 0x16c   :  { %v584_v7 = vpop.f32.mrf.mxu1  ;;  %v556_v10 = vadd.f32 %v555_v6, %v1818_v9  ;;  %1276 = vmatmul.msk.f32.gmra.mxu1 %vm400_vm2, %v1875_v5 }
 0x16d   :  { %v585_v11 = vadd.f32 %v584_v7, %v1818_v9 }
 0x16e   :  { %1411 = vtanh.f32 %v556_v10 }
 0x16f   :  { %1413 = vtanh.f32 %v585_v11  ;;  %v610_v16 = vpop.f32.mrf.mxu2  ;;  %1279 = vmatmul.msk.f32.gmra.mxu2 %vm400_vm2, %v1862_v60 }
 0x170   :  { %v639_v17 = vpop.f32.mrf.mxu3  ;;  %1415 = vtanh.f32 %v553_v8  ;;  %1283 = vmatmul.msk.f32.gmra.mxu3 %vm400_vm2, %v1862_v60  ;;  %v611_v30 = vadd.f32 %v610_v16, %v1820_v14 }
 0x171   :  { %1417 = vtanh.f32 %v582_v12  ;;  %v640_v35 = vadd.f32 %v639_v17, %v1820_v14  ;;  %v634_v14 = vadd.f32 %v1857_v58, %v1828_v24  ;;  %v1977_v17 = vld [vmem:[%s2038_s7] sm:$0x1]  ;;  %s1534_s7 = smov [#allocation3]  }
 0x172   :  { %1419 = vtanh.f32 %v550_v13  ;;  %s1187_s12 = sshll.u32 %s1534_s7, 4  ;;  %s1188_s12 = int_to_ptr.vmem [resolvable:$true] %s1187_s12 }
 0x173   :  { %1421 = vtanh.f32 %v579_v15  ;;  %1273 = vmatmul.msk.f32.gmra.mxu0 %vm400_vm2, %v1896_v19 }
 0x174   :  { %v1412_v21 = vpop.eup %1411  ;;  %1423 = vtanh.f32 %v547_v18  ;;  %1277 = vmatmul.msk.f32.gmra.mxu1 %vm400_vm2, %v1896_v19 }
 0x175   :  { %v1414_v22 = vpop.eup %1413  ;;  %1425 = vtanh.f32 %v576_v20  ;;  %845 = vmatpush.msrb.mxu0 %v1412_v21 }
 0x176   :  { %v1416_v25 = vpop.eup %1415  ;;  %874 = vmatpush.msrb.mxu1 %v1414_v22 }
 0x177   :  { %v1418_v26 = vpop.eup %1417  ;;  %v613_v27 = vpop.f32.mrf.mxu2  ;;  %846 = vmatpush.msrb.mxu0 %v1416_v25  ;;  %1280 = vmatmul.msk.f32.gmra.mxu2 %vm400_vm2, %v1875_v5 }
 0x178   :  { %v642_v28 = vpop.f32.mrf.mxu3  ;;  %v1420_v29 = vpop.eup %1419  ;;  %v614_v32 = vadd.f32 %v613_v27, %v1818_v9  ;;  %875 = vmatpush.msrb.mxu1 %v1418_v26  ;;  %1284 = vmatmul.msk.f32.gmra.mxu3 %vm400_vm2, %v1875_v5 }
 0x179   :  { %v643_v33 = vadd.f32 %v642_v28, %v1818_v9  ;;  %v1422_v34 = vpop.eup %1421  ;;  %847 = vmatpush.msrb.mxu0 %v1420_v29  ;;  %v605_v9 = vadd.f32 %v1855_v57, %v1828_v24 }
 0x17a   :  { %v1424_v37 = vpop.eup %1423  ;;  %1427 = vtanh.f32 %v614_v32  ;;  %876 = vmatpush.msrb.mxu1 %v1422_v34 }
 0x17b   :  { %v1426_v39 = vpop.eup %1425  ;;  %1429 = vtanh.f32 %v643_v33  ;;  %848 = vmatpush.msrb.mxu0 %v1424_v37 }
 0x17c   :  { %1431 = vtanh.f32 %v611_v30  ;;  %877 = vmatpush.msrb.mxu1 %v1426_v39  ;;  %1286 = vmatmul.msk.f32.vlgmr.msrb.gmra.mxu0 %vm400_vm2, %v1845_v49 }
 0x17d   :  { %1433 = vtanh.f32 %v640_v35  ;;  %1290 = vmatmul.msk.f32.vlgmr.msrb.gmra.mxu1 %vm400_vm2, %v1845_v49 }
 0x17e   :  { %1435 = vtanh.f32 %v608_v38 }
 0x17f   :  { %1437 = vtanh.f32 %v637_v40  ;;  %1281 = vmatmul.msk.f32.gmra.mxu2 %vm400_vm2, %v1896_v19 }
 0x180   :  { %v1428_v23 = vpop.eup %1427  ;;  %1439 = vtanh.f32 %v605_v9  ;;  %1285 = vmatmul.msk.f32.gmra.mxu3 %vm400_vm2, %v1896_v19 }
 0x181   :  { %v1430_v41 = vpop.eup %1429  ;;  %1441 = vtanh.f32 %v634_v14  ;;  %903 = vmatpush.msrb.mxu2 %v1428_v23 }
 0x182   :  { %v1432_v42 = vpop.eup %1431  ;;  %932 = vmatpush.msrb.mxu3 %v1430_v41 }
 0x183   :  { %v1434_v24 = vpop.eup %1433  ;;  %904 = vmatpush.msrb.mxu2 %v1432_v42 }
 0x184   :  { %v1436_v44 = vpop.eup %1435  ;;  %933 = vmatpush.msrb.mxu3 %v1434_v24  ;;  %1287 = vmatmul.msk.f32.gmra.mxu0 %vm400_vm2, %v1862_v60 }
 0x185   :  { %v1438_v45 = vpop.eup %1437  ;;  %1291 = vmatmul.msk.f32.gmra.mxu1 %vm400_vm2, %v1862_v60  ;;  %905 = vmatpush.msrb.mxu2 %v1436_v44 }
 0x186   :  { %v1440_v46 = vpop.eup %1439  ;;  %934 = vmatpush.msrb.mxu3 %v1438_v45 }
 0x187   :  { %v1442_v48 = vpop.eup %1441  ;;  %906 = vmatpush.msrb.mxu2 %v1440_v46 }
 0x188   :  { %935 = vmatpush.msrb.mxu3 %v1442_v48  ;;  %1294 = vmatmul.msk.f32.vlgmr.msrb.gmra.mxu2 %vm400_vm2, %v1845_v49 }
 0x189   :  { %1298 = vmatmul.msk.f32.vlgmr.msrb.gmra.mxu3 %vm400_vm2, %v1845_v49 }
 0x18c   :  { %1288 = vmatmul.msk.f32.gmra.mxu0 %vm400_vm2, %v1875_v5 }
 0x18d   :  { %1292 = vmatmul.msk.f32.gmra.mxu1 %vm400_vm2, %v1875_v5 }
 0x190   :  { %1295 = vmatmul.msk.f32.gmra.mxu2 %vm400_vm2, %v1862_v60 }
 0x191   :  { %1299 = vmatmul.msk.f32.gmra.mxu3 %vm400_vm2, %v1862_v60 }
 0x194   :  { %1289 = vmatmul.msk.f32.gmra.mxu0 %vm400_vm2, %v1896_v19 }
 0x195   :  { %1293 = vmatmul.msk.f32.gmra.mxu1 %vm400_vm2, %v1896_v19 }
 0x198   :  { %1296 = vmatmul.msk.f32.gmra.mxu2 %vm400_vm2, %v1875_v5 }
 0x199   :  { %1300 = vmatmul.msk.f32.gmra.mxu3 %vm400_vm2, %v1875_v5 }
 0x1a0   :  { %1297 = vmatmul.msk.f32.gmra.mxu2 %vm400_vm2, %v1896_v19 }
 0x1a1   :  { %1301 = vmatmul.msk.f32.gmra.mxu3 %vm400_vm2, %v1896_v19 }
 0x1d8   :  { %v734_v49 = vpop.f32.mrf.mxu0 }
 0x1d9   :  { %v763_v50 = vpop.f32.mrf.mxu1  ;;  %v735_v3 = vadd.f32 %v734_v49, %v1965_v1 }
 0x1da   :  { %v764_v4 = vadd.f32 %v763_v50, %v1965_v1 }
 0x1e0   :  { %v737_v51 = vpop.f32.mrf.mxu0 }
 0x1e1   :  { %v766_v52 = vpop.f32.mrf.mxu1  ;;  %v738_v63 = vadd.f32 %v737_v51, %v1960_v36 }
 0x1e2   :  { %v767_v2 = vadd.f32 %v766_v52, %v1960_v36 }
 0x1e8   :  { %v740_v53 = vpop.f32.mrf.mxu0 }
 0x1e9   :  { %v769_v31 = vpop.f32.mrf.mxu1  ;;  %v741_v58 = vadd.f32 %v740_v53, %v1956_v43 }
 0x1ea   :  { %v792_v55 = vpop.f32.mrf.mxu2  ;;  %v770_v61 = vadd.f32 %v769_v31, %v1956_v43 }
 0x1eb   :  { %v821_v56 = vpop.f32.mrf.mxu3  ;;  %v793_v33 = vadd.f32 %v792_v55, %v1965_v1 }
 0x1ec   :  { %v822_v34 = vadd.f32 %v821_v56, %v1965_v1 }
 0x1f0   :  { %v743_v57 = vpop.f32.mrf.mxu0 }
 0x1f1   :  { %v744_v59 = vadd.f32 %v743_v57, %v1954_v54  ;;  %v772_v60 = vpop.f32.mrf.mxu1 }
 0x1f2   :  { %v773_v62 = vadd.f32 %v772_v60, %v1954_v54  ;;  %v795_v47 = vpop.f32.mrf.mxu2 }
 0x1f3   :  { %1443 = vtanh.f32 %v744_v59  ;;  %v824_v0 = vpop.f32.mrf.mxu3  ;;  %v796_v30 = vadd.f32 %v795_v47, %v1960_v36 }
 0x1f4   :  { %1445 = vtanh.f32 %v773_v62  ;;  %v825_v32 = vadd.f32 %v824_v0, %v1960_v36 }
 0x1f5   :  { %1447 = vtanh.f32 %v741_v58 }
 0x1f6   :  { %1449 = vtanh.f32 %v770_v61 }
 0x1f7   :  { %1451 = vtanh.f32 %v738_v63 }
 0x1f8   :  { %1453 = vtanh.f32 %v767_v2 }
 0x1f9   :  { %v1444_v5 = vpop.eup %1443  ;;  %1455 = vtanh.f32 %v735_v3  ;;  %v1970_v6 = vpop.f32.mrf.mxu0 }
 0x1fa   :  { %v1446_v7 = vpop.eup %1445  ;;  %1457 = vtanh.f32 %v764_v4  ;;  %v1972_v8 = vpop.f32.mrf.mxu1  ;;  %1004 = vmatpush.msra.mxu0 %v1444_v5  ;;  %v851_v56 = vadd.f32 %v1970_v6, %v1965_v1 }
 0x1fb   :  { %v798_v10 = vpop.f32.mrf.mxu2  ;;  %v1448_v11 = vpop.eup %1447  ;;  %1024 = vmatpush.msra.mxu1 %v1446_v7  ;;  %v880_v57 = vadd.f32 %v1972_v8, %v1965_v1 }
 0x1fc   :  { %v827_v12 = vpop.f32.mrf.mxu3  ;;  %v1450_v13 = vpop.eup %1449  ;;  %1005 = vmatpush.msra.mxu0 %v1448_v11  ;;  %v799_v27 = vadd.f32 %v798_v10, %v1956_v43 }
 0x1fd   :  { %v1452_v15 = vpop.eup %1451  ;;  %1025 = vmatpush.msra.mxu1 %v1450_v13  ;;  %v828_v29 = vadd.f32 %v827_v12, %v1956_v43 }
 0x1fe   :  { %v1454_v16 = vpop.eup %1453  ;;  %1006 = vmatpush.msra.mxu0 %v1452_v15 }
 0x1ff   :  { %v1456_v18 = vpop.eup %1455  ;;  %1026 = vmatpush.msra.mxu1 %v1454_v16 }
 0x200   :  { %v1458_v19 = vpop.eup %1457  ;;  %1007 = vmatpush.msra.mxu0 %v1456_v18 }
 0x201   :  { %v853_v20 = vpop.f32.mrf.mxu0  ;;  %1027 = vmatpush.msra.mxu1 %v1458_v19  ;;  %1302 = vmatmul.msk.f32.vlgmr.msra.gmra.mxu0 %vm400_vm2, %v1977_v17 }
 0x202   :  { %v882_v21 = vpop.f32.mrf.mxu1  ;;  %1303 = vmatmul.msk.f32.vlgmr.msra.gmra.mxu1 %vm400_vm2, %v1977_v17  ;;  %v854_v53 = vadd.f32 %v853_v20, %v1960_v36 }
 0x203   :  { %v801_v22 = vpop.f32.mrf.mxu2  ;;  %v883_v55 = vadd.f32 %v882_v21, %v1960_v36 }
 0x204   :  { %v802_v25 = vadd.f32 %v801_v22, %v1954_v54  ;;  %v830_v26 = vpop.f32.mrf.mxu3 }
 0x205   :  { %v831_v28 = vadd.f32 %v830_v26, %v1954_v54 }
 0x206   :  { %1459 = vtanh.f32 %v802_v25  ;;  %v986_v25 = vpop.permute.xlu0 %985 }
 0x207   :  { %1461 = vtanh.f32 %v831_v28  ;;  %v988_v28 = vperm.slane %v986_v25, 0 }
 0x208   :  { %1463 = vtanh.f32 %v799_v27 }
 0x209   :  { %1465 = vtanh.f32 %v828_v29  ;;  %v856_v35 = vpop.f32.mrf.mxu0 }
 0x20a   :  { %1467 = vtanh.f32 %v796_v30  ;;  %v885_v37 = vpop.f32.mrf.mxu1  ;;  %v857_v45 = vadd.f32 %v856_v35, %v1956_v43 }
 0x20b   :  { %1469 = vtanh.f32 %v825_v32  ;;  %v1991_v38 = vpop.f32.mrf.mxu2  ;;  %v886_v50 = vadd.f32 %v885_v37, %v1956_v43 }
 0x20c   :  { %v1460_v39 = vpop.eup %1459  ;;  %1471 = vtanh.f32 %v793_v33  ;;  %v1993_v40 = vpop.f32.mrf.mxu3  ;;  %v909_v13 = vadd.f32 %v1991_v38, %v1965_v1 }
 0x20d   :  { %v1462_v9 = vpop.eup %1461  ;;  %1473 = vtanh.f32 %v822_v34  ;;  %1044 = vmatpush.msra.mxu2 %v1460_v39  ;;  %v938_v15 = vadd.f32 %v1993_v40, %v1965_v1 }
 0x20e   :  { %v1464_v14 = vpop.eup %1463  ;;  %1064 = vmatpush.msra.mxu3 %v1462_v9 }
 0x20f   :  { %v1466_v23 = vpop.eup %1465  ;;  %1045 = vmatpush.msra.mxu2 %v1464_v14 }
 0x210   :  { %v1468_v41 = vpop.eup %1467  ;;  %1065 = vmatpush.msra.mxu3 %v1466_v23 }
 0x211   :  { %v1470_v42 = vpop.eup %1469  ;;  %v859_v24 = vpop.f32.mrf.mxu0  ;;  %1046 = vmatpush.msra.mxu2 %v1468_v41 }
 0x212   :  { %v1472_v44 = vpop.eup %1471  ;;  %v860_v46 = vadd.f32 %v859_v24, %v1954_v54  ;;  %v888_v48 = vpop.f32.mrf.mxu1  ;;  %1066 = vmatpush.msra.mxu3 %v1470_v42 }
 0x213   :  { %v1474_v49 = vpop.eup %1473  ;;  %v889_v51 = vadd.f32 %v888_v48, %v1954_v54  ;;  %v911_v52 = vpop.f32.mrf.mxu2  ;;  %1047 = vmatpush.msra.mxu2 %v1472_v44 }
 0x214   :  { %1475 = vtanh.f32 %v860_v46  ;;  %v940_v31 = vpop.f32.mrf.mxu3  ;;  %1067 = vmatpush.msra.mxu3 %v1474_v49  ;;  %1304 = vmatmul.msk.f32.vlgmr.msra.gmra.mxu2 %vm400_vm2, %v1977_v17  ;;  %v912_v11 = vadd.f32 %v911_v52, %v1960_v36 }
 0x215   :  { %1477 = vtanh.f32 %v889_v51  ;;  %1305 = vmatmul.msk.f32.vlgmr.msra.gmra.mxu3 %vm400_vm2, %v1977_v17  ;;  %v941_v12 = vadd.f32 %v940_v31, %v1960_v36 }
 0x216   :  { %1479 = vtanh.f32 %v857_v45 }
 0x217   :  { %1481 = vtanh.f32 %v886_v50 }
 0x218   :  { %1483 = vtanh.f32 %v854_v53 }
 0x219   :  { %1485 = vtanh.f32 %v883_v55 }
 0x21a   :  { %v1476_v58 = vpop.eup %1475  ;;  %1487 = vtanh.f32 %v851_v56 }
 0x21b   :  { %v1478_v59 = vpop.eup %1477  ;;  %1489 = vtanh.f32 %v880_v57  ;;  %v914_v60 = vpop.f32.mrf.mxu2  ;;  %1084 = vmatpush.msrb.mxu0 %v1476_v58 }
 0x21c   :  { %v1480_v61 = vpop.eup %1479  ;;  %v943_v62 = vpop.f32.mrf.mxu3  ;;  %1104 = vmatpush.msrb.mxu1 %v1478_v59  ;;  %v915_v5 = vadd.f32 %v914_v60, %v1956_v43 }
 0x21d   :  { %v1482_v47 = vpop.eup %1481  ;;  %1085 = vmatpush.msrb.mxu0 %v1480_v61  ;;  %v944_v8 = vadd.f32 %v943_v62, %v1956_v43 }
 0x21e   :  { %v1484_v63 = vpop.eup %1483  ;;  %1105 = vmatpush.msrb.mxu1 %v1482_v47 }
 0x21f   :  { %v1486_v0 = vpop.eup %1485  ;;  %1086 = vmatpush.msrb.mxu0 %v1484_v63 }
 0x220   :  { %v1488_v2 = vpop.eup %1487  ;;  %1106 = vmatpush.msrb.mxu1 %v1486_v0 }
 0x221   :  { %v1490_v3 = vpop.eup %1489  ;;  %1087 = vmatpush.msrb.mxu0 %v1488_v2 }
 0x222   :  { %1107 = vmatpush.msrb.mxu1 %v1490_v3  ;;  %1306 = vmatmul.msk.f32.vlgmr.msrb.gmra.mxu0 %vm400_vm2, %v1977_v17 }
 0x223   :  { %1307 = vmatmul.msk.f32.vlgmr.msrb.gmra.mxu1 %vm400_vm2, %v1977_v17  ;;  %v917_v4 = vpop.f32.mrf.mxu2 }
 0x224   :  { %v918_v6 = vadd.f32 %v917_v4, %v1954_v54  ;;  %v946_v7 = vpop.f32.mrf.mxu3 }
 0x225   :  { %v947_v10 = vadd.f32 %v946_v7, %v1954_v54 }
 0x226   :  { %1491 = vtanh.f32 %v918_v6 }
 0x227   :  { %1493 = vtanh.f32 %v947_v10 }
 0x228   :  { %1495 = vtanh.f32 %v915_v5 }
 0x229   :  { %1497 = vtanh.f32 %v944_v8 }
 0x22a   :  { %1499 = vtanh.f32 %v912_v11 }
 0x22b   :  { %1501 = vtanh.f32 %v941_v12 }
 0x22c   :  { %v1492_v16 = vpop.eup %1491  ;;  %1503 = vtanh.f32 %v909_v13 }
 0x22d   :  { %v1494_v43 = vpop.eup %1493  ;;  %1505 = vtanh.f32 %v938_v15  ;;  %1124 = vmatpush.msrb.mxu2 %v1492_v16 }
 0x22e   :  { %v1496_v54 = vpop.eup %1495  ;;  %1144 = vmatpush.msrb.mxu3 %v1494_v43 }
 0x22f   :  { %v1498_v18 = vpop.eup %1497  ;;  %1125 = vmatpush.msrb.mxu2 %v1496_v54 }
 0x230   :  { %v1500_v36 = vpop.eup %1499  ;;  %1145 = vmatpush.msrb.mxu3 %v1498_v18 }
 0x231   :  { %v1502_v19 = vpop.eup %1501  ;;  %1126 = vmatpush.msrb.mxu2 %v1500_v36 }
 0x232   :  { %v1504_v20 = vpop.eup %1503  ;;  %1146 = vmatpush.msrb.mxu3 %v1502_v19 }
 0x233   :  { %v1506_v21 = vpop.eup %1505  ;;  %1127 = vmatpush.msrb.mxu2 %v1504_v20 }
 0x234   :  { %1147 = vmatpush.msrb.mxu3 %v1506_v21  ;;  %1308 = vmatmul.msk.f32.vlgmr.msrb.gmra.mxu2 %vm400_vm2, %v1977_v17 }
 0x235   :  { %1309 = vmatmul.msk.f32.vlgmr.msrb.gmra.mxu3 %vm400_vm2, %v1977_v17 }
 0x27e   :  { %v1009_v1 = vpop.f32.mrf.mxu0 }
 0x27f   :  { %v1029_v22 = vpop.f32.mrf.mxu1  ;;  %v1010_v44 = vadd.f32 %v1009_v1, %v988_v28 }
 0x280   :  { %v1030_v34 = vadd.f32 %v1029_v22, %v988_v28 }
 0x282   :  { %v1160_v17 = vrot.slane %v1030_v34, 7 }
 0x284   :  { %v1168_v48 = vsel %vm1167_vm4, %v1010_v44, %v1160_v17 }
 0x297   :  { %v1049_v26 = vpop.f32.mrf.mxu2 }
 0x298   :  { %v1069_v27 = vpop.f32.mrf.mxu3  ;;  %v1050_v32 = vadd.f32 %v1049_v26, %v988_v28 }
 0x299   :  { %v1070_v33 = vadd.f32 %v1069_v27, %v988_v28 }
 0x29a   :  { %v1161_v38 = vrot.slane %v1050_v32, 6 }
 0x29b   :  { %v1162_v39 = vrot.slane %v1070_v33, 5 }
 0x29d   :  { %v1170_v45 = vsel %vm1169_vm3, %v1161_v38, %v1162_v39 }
 0x29e   :  { %v1171_v51 = vsel %vm91_vm0, %v1168_v48, %v1170_v45 }
 0x29f   :  { %v1089_v29 = vpop.f32.mrf.mxu0 }
 0x2a0   :  { %v1109_v30 = vpop.f32.mrf.mxu1  ;;  %v1090_v35 = vadd.f32 %v1089_v29, %v988_v28 }
 0x2a1   :  { %v1110_v37 = vadd.f32 %v1109_v30, %v988_v28 }
 0x2a2   :  { %v1163_v23 = vrot.slane %v1090_v35, 4 }
 0x2a3   :  { %v1164_v41 = vrot.slane %v1110_v37, 3 }
 0x2a5   :  { %v1173_v49 = vsel %vm1172_vm5, %v1163_v23, %v1164_v41 }
 0x2b7   :  { %v1129_v40 = vpop.f32.mrf.mxu2 }
 0x2b8   :  { %v1130_v9 = vadd.f32 %v1129_v40, %v988_v28  ;;  %v1149_v14 = vpop.f32.mrf.mxu3 }
 0x2b9   :  { %v1150_v42 = vadd.f32 %v1149_v14, %v988_v28 }
 0x2ba   :  { %v1165_v24 = vrot.slane %v1130_v9, 2 }
 0x2bb   :  { %v1166_v46 = vrot.slane %v1150_v42, 1 }
 0x2bd   :  { %v1175_v50 = vsel %vm1174_vm6, %v1165_v24, %v1166_v46 }
 0x2be   :  { %v1177_v52 = vsel %vm1176_vm7, %v1173_v49, %v1175_v50 }
 0x2bf   :  { %v1179_v53 = vsel %vm1178_vm8, %v1171_v51, %v1177_v52 }
 0x2c0   :  { %1181 = vst [vmem:[#allocation3] sm:$0xff] %v1179_v53 }
 0x2c1   :  { %1192 = dma.vmem_to_hbm [thread:$0]  %s1188_s12, 128, %s1190_s1, [#allocation4]  }
 0x2c2   :  { %1531 = dma.done.wait [#allocation4], 128  }
 0x2c3   :  { %1532 = vsyncadd [#allocation4], 4294967168 }
 0x2c4   :  { %1197 = vsyncpa [#allocation4], 1 }

</bundles_post_ra>
